<compile_context>
chip_gen: v6e
topology: v6e:2x2x1
jax: 0.10.0
libtpu: 0.0.40
codegen_flags: <defaults>
</compile_context>

<pallas_src>
import jax
import jax.numpy as jnp
from jax import lax
from jax.experimental import pallas as pl
from jax.experimental.pallas import tpu as pltpu


def _round_up(x, m):
    return ((x + m - 1) // m) * m


def _mtc_kernel(x_ref, w1_ref, b1_ref, w2_ref, b2_ref, wh_ref, bh_ref, out_ref):
    # shared: Linear(input_dim,64) + ReLU + [Dropout=id] + Linear(64,32) + ReLU + [Dropout=id]
    x = x_ref[...]                                                   # bf16 tile [TB, D]
    h1 = jnp.dot(x, w1_ref[...], preferred_element_type=jnp.float32) + b1_ref[...]
    h1 = jnp.maximum(h1, 0.0)
    h2 = jnp.dot(h1.astype(w2_ref.dtype), w2_ref[...],
                 preferred_element_type=jnp.float32) + b2_ref[...]
    h2 = jnp.maximum(h2, 0.0)

    # fused heads: [binary_logit | model_logits | zero-pad]  ->  [TB, HP]
    z = jnp.dot(h2.astype(wh_ref.dtype), wh_ref[...],
                preferred_element_type=jnp.float32) + bh_ref[...]

    # numerically stable sigmoid on EUP (exp) + approx reciprocal
    e = jnp.exp(-jnp.abs(z))                          # in (0, 1], never overflows
    sig = pl.reciprocal(1.0 + e, approx=True)         # sigmoid(|z|)
    sig = jnp.where(z >= 0, sig, 1.0 - sig)           # sigmoid(z)

    # apply sigmoid only to the binary-head column (lane 0)
    col = lax.broadcasted_iota(jnp.int32, z.shape, dimension=1)
    out_ref[...] = jnp.where(col == 0, sig, z)


def multitask_classifier(x, params, *, batch_tile=512, compute_dtype=jnp.bfloat16):
    """x: [B, input_dim] float32. params: dict (see init_params).
    Returns (binary_out [B,1], model_out [B,num_model_classes]) in float32."""
    B, D = x.shape
    C = params["wm"].shape[1]

    # ---- fuse + pad the two heads to a lane-dense (multiple of 128) width ----
    w_heads = jnp.concatenate([params["wb"], params["wm"]], axis=1)   # [32, 1+C]
    b_heads = jnp.concatenate([params["bb"], params["bm"]], axis=1)   # [1, 1+C]
    HP = _round_up(1 + C, 128)
    pad_h = HP - (1 + C)
    if pad_h:
        w_heads = jnp.pad(w_heads, ((0, 0), (0, pad_h)))
        b_heads = jnp.pad(b_heads, ((0, 0), (0, pad_h)))

    # ---- dtypes: bf16 matmul operands, f32 biases / accumulation ----
    w1 = params["w1"].astype(compute_dtype)
    w2 = params["w2"].astype(compute_dtype)
    w_heads = w_heads.astype(compute_dtype)
    b1 = params["b1"].astype(jnp.float32)
    b2 = params["b2"].astype(jnp.float32)
    b_heads = b_heads.astype(jnp.float32)

    # ---- batch tiling (tile multiple of 8; pad B up to a multiple of the tile) ----
    TB = min(_round_up(batch_tile, 8), _round_up(B, 8))
    B_pad = _round_up(B, TB)
    x_p = x
    if B_pad != B:
        x_p = jnp.pad(x, ((0, B_pad - B), (0, 0)))
    x_p = x_p.astype(compute_dtype)
    grid = (B_pad // TB,)

    whole = lambda a: pl.BlockSpec(a.shape, lambda i: (0,) * a.ndim)

    heads = pl.pallas_call(
        _mtc_kernel,
        out_shape=jax.ShapeDtypeStruct((B_pad, HP), jnp.float32),
        grid=grid,
        in_specs=[
            pl.BlockSpec((TB, D), lambda i: (i, 0)),   # x: tiled along batch
            whole(w1), whole(b1),                      # weights/biases: VMEM-resident
            whole(w2), whole(b2),
            whole(w_heads), whole(b_heads),
        ],
        out_specs=pl.BlockSpec((TB, HP), lambda i: (i, 0)),
        compiler_params=pltpu.CompilerParams(
            dimension_semantics=("parallel",),
        ),
    )(x_p, w1, b1, w2, b2, w_heads, b_heads)

    binary_out = heads[:B, 0:1]
    model_out = heads[:B, 1:1 + C]
    return binary_out, model_out


def init_params(key, input_dim, num_model_classes):
    """Deterministic parameter init matching the PyTorch module's shapes.
    Linear weights stored as [in, out] (transposed vs. torch's [out, in])."""
    ks = jax.random.split(key, 8)

    def lin(k_w, k_b, fan_in, fan_out):
        bound = 1.0 / jnp.sqrt(fan_in)
        w = jax.random.uniform(k_w, (fan_in, fan_out), jnp.float32, -bound, bound)
        b = jax.random.uniform(k_b, (1, fan_out), jnp.float32, -bound, bound)
        return w, b

    w1, b1 = lin(ks[0], ks[1], input_dim, 64)
    w2, b2 = lin(ks[2], ks[3], 64, 32)
    wb, bb = lin(ks[4], ks[5], 32, 1)
    wm, bm = lin(ks[6], ks[7], 32, num_model_classes)
    return dict(w1=w1, b1=b1, w2=w2, b2=b2, wb=wb, bb=bb, wm=wm, bm=bm)


def _reference(x, p):
    h1 = jnp.maximum(x @ p["w1"] + p["b1"], 0.0)
    h2 = jnp.maximum(h1 @ p["w2"] + p["b2"], 0.0)
    return jax.nn.sigmoid(h2 @ p["wb"] + p["bb"]), h2 @ p["wm"] + p["bm"]


if __name__ == "__main__":
    key = jax.random.PRNGKey(0)
    k_x, k_x2, k_p = jax.random.split(key, 3)

    input_dim, num_model_classes = 32, 8
    params = init_params(k_p, input_dim, num_model_classes)

    # case 1: tiny batch (single grid step)
    batch = 8
    x = jax.random.normal(k_x, (batch, input_dim), jnp.float32)
    binary_out, model_out = multitask_classifier(x, params)
    jax.block_until_ready((binary_out, model_out))
    ref_bin, ref_model = _reference(x, params)
    assert binary_out.shape == (batch, 1)
    assert model_out.shape == (batch, num_model_classes)
    # bf16 matmuls + approx reciprocal -> loose tolerance vs f32 reference
    assert jnp.allclose(binary_out, ref_bin, atol=3e-2), \
        float(jnp.max(jnp.abs(binary_out - ref_bin)))
    assert jnp.allclose(model_out, ref_model, atol=3e-2), \
        float(jnp.max(jnp.abs(model_out - ref_model)))

    # case 2: batch not a multiple of the tile, multi-step grid (exercises padding
    # + VMEM-resident weights across grid steps)
    batch2 = 20
    x2 = jax.random.normal(k_x2, (batch2, input_dim), jnp.float32)
    bin2, mdl2 = multitask_classifier(x2, params, batch_tile=8)
    jax.block_until_ready((bin2, mdl2))
    ref_bin2, ref_model2 = _reference(x2, params)
    assert bin2.shape == (batch2, 1)
    assert mdl2.shape == (batch2, num_model_classes)
    assert jnp.allclose(bin2, ref_bin2, atol=3e-2)
    assert jnp.allclose(mdl2, ref_model2, atol=3e-2)

    print("KERNEL_OK")
</pallas_src>

<mosaic_0001>
module attributes {stable_mosaic.version = 11 : i64} {
  func.func @_mtc_kernel(%arg0: i32, %arg1: memref<8x32xbf16, #tpu.memory_space<vmem>>, %arg2: memref<32x64xbf16, #tpu.memory_space<vmem>>, %arg3: memref<1x64xf32, #tpu.memory_space<vmem>>, %arg4: memref<64x32xbf16, #tpu.memory_space<vmem>>, %arg5: memref<1x32xf32, #tpu.memory_space<vmem>>, %arg6: memref<32x128xbf16, #tpu.memory_space<vmem>>, %arg7: memref<1x128xf32, #tpu.memory_space<vmem>>, %arg8: memref<8x128xf32, #tpu.memory_space<vmem>>) attributes {dimension_semantics = [#tpu.dimension_semantics<parallel>], iteration_bounds = array<i64: 1>, scalar_prefetch = 0 : i64, scratch_operands = 0 : i64, tpu.core_type = #tpu.core_type<tc>, window_params = [{transform_indices = @transform_0, window_bounds = array<i64: 8, 32>}, {pipeline_mode = #tpu.pipeline_mode<synchronous>, transform_indices = @transform_1, window_bounds = array<i64: 32, 64>}, {pipeline_mode = #tpu.pipeline_mode<synchronous>, transform_indices = @transform_2, window_bounds = array<i64: 1, 64>}, {pipeline_mode = #tpu.pipeline_mode<synchronous>, transform_indices = @transform_3, window_bounds = array<i64: 64, 32>}, {pipeline_mode = #tpu.pipeline_mode<synchronous>, transform_indices = @transform_4, window_bounds = array<i64: 1, 32>}, {pipeline_mode = #tpu.pipeline_mode<synchronous>, transform_indices = @transform_5, window_bounds = array<i64: 32, 128>}, {pipeline_mode = #tpu.pipeline_mode<synchronous>, transform_indices = @transform_6, window_bounds = array<i64: 1, 128>}, {transform_indices = @transform_7, window_bounds = array<i64: 8, 128>}]} {
    %c0 = arith.constant 0 : index
    %c0_0 = arith.constant 0 : index
    %0 = vector.load %arg1[%c0, %c0_0] : memref<8x32xbf16, #tpu.memory_space<vmem>>, vector<8x32xbf16>
    %c0_1 = arith.constant 0 : index
    %c0_2 = arith.constant 0 : index
    %1 = vector.load %arg2[%c0_1, %c0_2] : memref<32x64xbf16, #tpu.memory_space<vmem>>, vector<32x64xbf16>
    %cst = arith.constant dense<0.000000e+00> : vector<8x64xf32>
    %2 = tpu.matmul %0, %1, %cst {dimension_numbers = #tpu.dot_dimension_numbers<[1], [0], [0], [1], [0, 0, 1, 1], [], []>} : vector<8x32xbf16>, vector<32x64xbf16>, vector<8x64xf32> -> vector<8x64xf32>
    %c0_3 = arith.constant 0 : index
    %c0_4 = arith.constant 0 : index
    %3 = vector.load %arg3[%c0_3, %c0_4] : memref<1x64xf32, #tpu.memory_space<vmem>>, vector<1x64xf32>
    %4 = vector.broadcast %3 : vector<1x64xf32> to vector<8x64xf32>
    %5 = arith.addf %2, %4 : vector<8x64xf32>
    %cst_5 = arith.constant 0.000000e+00 : f32
    %6 = vector.broadcast %cst_5 : f32 to vector<8x64xf32>
    %7 = arith.maximumf %5, %6 : vector<8x64xf32>
    %8 = arith.truncf %7 : vector<8x64xf32> to vector<8x64xbf16>
    %c0_6 = arith.constant 0 : index
    %c0_7 = arith.constant 0 : index
    %9 = vector.load %arg4[%c0_6, %c0_7] : memref<64x32xbf16, #tpu.memory_space<vmem>>, vector<64x32xbf16>
    %cst_8 = arith.constant dense<0.000000e+00> : vector<8x32xf32>
    %10 = tpu.matmul %8, %9, %cst_8 {dimension_numbers = #tpu.dot_dimension_numbers<[1], [0], [0], [1], [0, 0, 1, 1], [], []>} : vector<8x64xbf16>, vector<64x32xbf16>, vector<8x32xf32> -> vector<8x32xf32>
    %c0_9 = arith.constant 0 : index
    %c0_10 = arith.constant 0 : index
    %11 = vector.load %arg5[%c0_9, %c0_10] : memref<1x32xf32, #tpu.memory_space<vmem>>, vector<1x32xf32>
    %12 = vector.broadcast %11 : vector<1x32xf32> to vector<8x32xf32>
    %13 = arith.addf %10, %12 : vector<8x32xf32>
    %cst_11 = arith.constant 0.000000e+00 : f32
    %14 = vector.broadcast %cst_11 : f32 to vector<8x32xf32>
    %15 = arith.maximumf %13, %14 : vector<8x32xf32>
    %16 = arith.truncf %15 : vector<8x32xf32> to vector<8x32xbf16>
    %c0_12 = arith.constant 0 : index
    %c0_13 = arith.constant 0 : index
    %17 = vector.load %arg6[%c0_12, %c0_13] : memref<32x128xbf16, #tpu.memory_space<vmem>>, vector<32x128xbf16>
    %cst_14 = arith.constant dense<0.000000e+00> : vector<8x128xf32>
    %18 = tpu.matmul %16, %17, %cst_14 {dimension_numbers = #tpu.dot_dimension_numbers<[1], [0], [0], [1], [0, 0, 1, 1], [], []>} : vector<8x32xbf16>, vector<32x128xbf16>, vector<8x128xf32> -> vector<8x128xf32>
    %c0_15 = arith.constant 0 : index
    %c0_16 = arith.constant 0 : index
    %19 = vector.load %arg7[%c0_15, %c0_16] : memref<1x128xf32, #tpu.memory_space<vmem>>, vector<1x128xf32>
    %20 = vector.broadcast %19 : vector<1x128xf32> to vector<8x128xf32>
    %21 = arith.addf %18, %20 : vector<8x128xf32>
    %22 = math.absf %21 : vector<8x128xf32>
    %cst_17 = arith.constant 0.000000e+00 : f32
    %23 = vector.broadcast %cst_17 : f32 to vector<8x128xf32>
    %24 = arith.subf %23, %22 : vector<8x128xf32>
    %25 = math.exp %24 : vector<8x128xf32>
    %cst_18 = arith.constant 1.000000e+00 : f32
    %26 = vector.broadcast %cst_18 : f32 to vector<8x128xf32>
    %27 = arith.addf %26, %25 : vector<8x128xf32>
    %28 = tpu.reciprocal %27 {approx = true} : vector<8x128xf32> -> vector<8x128xf32>
    %cst_19 = arith.constant 0.000000e+00 : f32
    %29 = vector.broadcast %cst_19 : f32 to vector<8x128xf32>
    %30 = arith.cmpf oge, %21, %29 : vector<8x128xf32>
    %cst_20 = arith.constant 1.000000e+00 : f32
    %31 = vector.broadcast %cst_20 : f32 to vector<8x128xf32>
    %32 = arith.subf %31, %28 : vector<8x128xf32>
    %33 = arith.select %30, %28, %32 : vector<8x128xi1>, vector<8x128xf32>
    %34 = tpu.iota {dimensions = array<i32: 1>} : vector<8x128xi32>
    %c0_i32 = arith.constant 0 : i32
    %35 = vector.broadcast %c0_i32 : i32 to vector<8x128xi32>
    %36 = arith.cmpi eq, %34, %35 : vector<8x128xi32>
    %37 = arith.select %36, %33, %21 : vector<8x128xi1>, vector<8x128xf32>
    %c0_21 = arith.constant 0 : index
    %c0_22 = arith.constant 0 : index
    %38 = vector.load %arg8[%c0_21, %c0_22] : memref<8x128xf32, #tpu.memory_space<vmem>>, vector<8x128xf32>
    tpu.vector_store %arg8[%c0_21, %c0_22], %37 {strides = array<i32>} : memref<8x128xf32, #tpu.memory_space<vmem>>, vector<8x128xf32>,
    return
  }
  func.func @transform_0(%arg0: i32) -> (i32, i32) {
    %c0_i32 = arith.constant 0 : i32
    %c0_i32_0 = arith.constant 0 : i32
    return %arg0, %c0_i32 : i32, i32
  }
  func.func @transform_1(%arg0: i32) -> (i32, i32) {
    %c0_i32 = arith.constant 0 : i32
    %c0_i32_0 = arith.constant 0 : i32
    %c0_i32_1 = arith.constant 0 : i32
    return %c0_i32, %c0_i32_0 : i32, i32
  }
  func.func @transform_2(%arg0: i32) -> (i32, i32) {
    %c0_i32 = arith.constant 0 : i32
    %c0_i32_0 = arith.constant 0 : i32
    %c0_i32_1 = arith.constant 0 : i32
    return %c0_i32, %c0_i32_0 : i32, i32
  }
  func.func @transform_3(%arg0: i32) -> (i32, i32) {
    %c0_i32 = arith.constant 0 : i32
    %c0_i32_0 = arith.constant 0 : i32
    %c0_i32_1 = arith.constant 0 : i32
    return %c0_i32, %c0_i32_0 : i32, i32
  }
  func.func @transform_4(%arg0: i32) -> (i32, i32) {
    %c0_i32 = arith.constant 0 : i32
    %c0_i32_0 = arith.constant 0 : i32
    %c0_i32_1 = arith.constant 0 : i32
    return %c0_i32, %c0_i32_0 : i32, i32
  }
  func.func @transform_5(%arg0: i32) -> (i32, i32) {
    %c0_i32 = arith.constant 0 : i32
    %c0_i32_0 = arith.constant 0 : i32
    %c0_i32_1 = arith.constant 0 : i32
    return %c0_i32, %c0_i32_0 : i32, i32
  }
  func.func @transform_6(%arg0: i32) -> (i32, i32) {
    %c0_i32 = arith.constant 0 : i32
    %c0_i32_0 = arith.constant 0 : i32
    %c0_i32_1 = arith.constant 0 : i32
    return %c0_i32, %c0_i32_0 : i32, i32
  }
  func.func @transform_7(%arg0: i32) -> (i32, i32) {
    %c0_i32 = arith.constant 0 : i32
    %c0_i32_0 = arith.constant 0 : i32
    return %arg0, %c0_i32 : i32, i32
  }
}

</mosaic_0001>

<bundles_post_ra>
// kernel: tpu_custom_call.1
= control target key start
LH: loop header
LB: loop body
LE: loop exit
PB: predicated region body
PF: predicated region fallthrough
CT: control target
= control target key end

     0   :  { %v367_v1 = vmov 0.0   ;;  %vm368_vm0 = vmmov 0   ;;  %vm52_vm1 = vcmask 261120   ;;  %s454_s0 = inlined_call_operand.vmem [shape: bf16[8,32], index: 0, kind: input, shape index: {}]   ;;  %s455_s1 = inlined_call_operand.vmem [shape: bf16[32,64], index: 1, kind: input, shape index: {}]   ;;  %s456_s2 = inlined_call_operand.vmem [shape: f32[1,64], index: 2, kind: input, shape index: {}]   ;;  %s457_s3 = inlined_call_operand.vmem [shape: bf16[64,32], index: 3, kind: input, shape index: {}]   ;;  %s458_s4 = inlined_call_operand.vmem [shape: f32[1,32], index: 4, kind: input, shape index: {}]   ;;  %s459_s5 = inlined_call_operand.vmem [shape: bf16[32,128], index: 5, kind: input, shape index: {}]   ;;  %s460_s6 = inlined_call_operand.vmem [shape: f32[1,128], index: 6, kind: input, shape index: {}]   ;;  %s461_s7 = inlined_call_operand.hbm [shape: f32[8,128], index: 7, kind: output, shape index: {}]  }
   0x1   :  { %v333_v0 = vld [vmem:[%s455_s1 + $0x8] sm:$0xff]   ;;  %302 = vmatprep.subr.bf16.mxu0 %v367_v1  ;;  %310 = vmatprep.subr.bf16.mxu1 %v367_v1  ;;  %v334_v2 = vld [vmem:[%s455_s1] sm:$0xff]   ;;  %v335_v3 = vld [vmem:[%s457_s3 + $0x18] sm:$0xff]  }
   0x2   :  { %303 = vmatpush3.bf16.msra.mxu0 %v333_v0  ;;  %306 = vmatprep.mubr.msk.bf16.mxu0 %vm368_vm0, %v367_v1  ;;  %v28_v4 = vld [vmem:[%s454_s0] sm:$0xf]  ;;  %v336_v5 = vld [vmem:[%s457_s3 + $0x10] sm:$0xff]  }
   0x3   :  { %304 = vmatprep.subr.bf16.mxu0 %v367_v1  ;;  %318 = vmatprep.mubr.msk.bf16.mxu1 %vm368_vm0, %v367_v1 }
   0x4   :  { %311 = vmatpush3.bf16.msra.mxu1 %v335_v3 }
   0x5   :  { %312 = vmatprep.subr.bf16.mxu1 %v367_v1 }
   0x6   :  { %305 = vmatpush3.bf16.msra.mxu0 %v334_v2 }
   0x7   :  { %322 = vmatprep.subr.bf16.mxu0 %v367_v1 }
   0x8   :  { %12 = vsyncpa [#allocation3], 0  ;;  %313 = vmatpush3.bf16.msra.mxu1 %v336_v5  ;;  %v337_v6 = vld [vmem:[%s457_s3 + $0x8] sm:$0xff]   ;;  %v338_v7 = vld [vmem:[%s457_s3] sm:$0xff]   ;;  %vm137_vm2 = vcmask 523264   ;;  %v258_v37 = vlaneseq }
   0x9   :  { %307 = vmatmul.mubr.msk.bf16.vlgmr.msra.gmra.mxu0 %vm52_vm1, %v28_v4  ;;  %314 = vmatprep.subr.bf16.mxu1 %v367_v1  ;;  %v339_v8 = vld [vmem:[%s459_s5 + $0x8] sm:$0xff]   ;;  %v277_v9 = vld [vmem:[%s456_s2] ss:$0 sm:$0xff] }
   0xa   :  { %326 = vmatprep.mubr.msk.bf16.mxu0 %vm368_vm0, %v367_v1  ;;  %323 = vmatpush3.bf16.msra.mxu0 %v339_v8  ;;  %v340_v17 = vld [vmem:[%s459_s5] sm:$0xff]   ;;  %v259_v38 = vand.u32 127, %v258_v37 }
   0xb   :  { %324 = vmatprep.subr.bf16.mxu0 %v367_v1  ;;  %v281_v18 = vld [vmem:[%s458_s4] ss:$0 sm:$0xff]  ;;  %s369_s4 = smov [#allocation2]  }
   0xc   :  { %315 = vmatpush3.bf16.msra.mxu1 %v337_v6  ;;  %v287_v26 = vld [vmem:[%s460_s6] ss:$0 sm:$0xff]  ;;  %s269_s5 = sshll.u32 %s369_s4, 4  ;;  %vm260_vm3 = vcmp.eq.s32.totalorder %v259_v38, 0  ;;  %s270_s5 = int_to_ptr.vmem [resolvable:$true] %s269_s5 }
   0xd   :  { %316 = vmatprep.subr.bf16.mxu1 %v367_v1  ;;  %s345_s6 = scalar_lea.vmem %s270_s5, 128  ;;  %p350_p1 = scmp.lt.s32.totalorder %s270_s5, %s270_s5 }
   0xe   :  { %325 = vmatpush3.bf16.msra.mxu0 %v340_v17  ;;  %p346_p0 = scmp.ne.s32.totalorder %s270_s5, %s345_s6  ;;  %p351_p2 = scmp.lt.s32.totalorder %s345_s6, %s345_s6 }
  0x10   :  { %317 = vmatpush3.bf16.msra.mxu1 %v338_v7  ;;  %p352_p3 = por %p351_p2, %p350_p1 }
  0x12   :  { %p353_p4 = pnand %p352_p3, %p346_p0 }
  0xc9   :  { %v90_v10 = vpop.f32.mrf.mxu0 }
  0xca   :  { %v91_v11 = vadd.f32 %v277_v9, %v90_v10 }
  0xcb   :  { %v308_v12 = vpop.f32.mrf.mxu0 }
  0xcc   :  { %v96_v13 = vmax.f32 %v91_v11, 0.0 }
  0xcd   :  { %v93_v14 = vpop.f32.mrf.mxu0 }
  0xce   :  { %v97_v15 = vpack.c.bf16 %v96_v13, %v96_v13 }
  0xcf   :  { %v309_v16 = vpop.f32.mrf.mxu0 }
  0xd0   :  { %319 = vmatmul.mubr.msk.bf16.vlgmr.msra.gmra.mxu1 %vm137_vm2, %v97_v15 }
 0x190   :  { %v175_v19 = vpop.f32.mrf.mxu1 }
 0x191   :  { %v176_v20 = vadd.f32 %v281_v18, %v175_v19 }
 0x192   :  { %v320_v21 = vpop.f32.mrf.mxu1 }
 0x193   :  { %v181_v22 = vmax.f32 %v176_v20, 0.0 }
 0x194   :  { %v178_v23 = vpop.f32.mrf.mxu1 }
 0x195   :  { %v182_v24 = vpack.c.bf16 %v181_v22, %v181_v22 }
 0x196   :  { %v321_v25 = vpop.f32.mrf.mxu1 }
 0x197   :  { %327 = vmatmul.mubr.msk.bf16.vlgmr.msra.gmra.mxu0 %vm52_vm1, %v182_v24 }
 0x257   :  { %v243_v27 = vpop.f32.mrf.mxu0 }
 0x258   :  { %v244_v28 = vadd.f32 %v287_v26, %v243_v27 }
 0x259   :  { %v328_v29 = vpop.f32.mrf.mxu0 }
 0x25a   :  { %v249_v30 = vand.u32 2147483647, %v244_v28  ;;  %vm255_vm4 = vcmp.ge.f32.partialorder %v244_v28, 0.0 }
 0x25b   :  { %v246_v31 = vpop.f32.mrf.mxu0 }
 0x25c   :  { %v250_v32 = vsub.f32 0.0, %v249_v30 }
 0x25d   :  { %v329_v33 = vpop.f32.mrf.mxu0 }
 0x25e   :  { %v251_v34 = vmul.f32 1.442695, %v250_v32 }
 0x260   :  { %341 = vpow2.f32 %v251_v34 }
 0x26d   :  { %v342_v35 = vpop.eup %341 }
 0x26e   :  { %v253_v36 = vadd.f32 1.0, %v342_v35 }
 0x270   :  { %343 = vrcp.f32 %v253_v36 }
 0x27d   :  { %v344_v39 = vpop.eup %343 }
 0x27e   :  { %v256_v40 = vsub.f32 1.0, %v344_v39 }
 0x280   :  { %v257_v41 = vsel %vm255_vm4, %v344_v39, %v256_v40 }
 0x281   :  { %v261_v42 = vsel %vm260_vm3, %v257_v41, %v244_v28 }
 0x282   :  { %262 = vst [vmem:[#allocation2] sm:$0xff] %v261_v42 }
 0x283   :  { %356 = shalt.err (!%p353_p4)
}
 0x284   :  { %272 = dma.vmem_to_hbm [thread:$0]  %s270_s5, 128, %s461_s7, [#allocation3]  }
 0x285   :  { %365 = dma.done.wait [#allocation3], 128  }
 0x286   :  { %366 = vsyncadd [#allocation3], 4294967168 }
 0x287   :  { %276 = vsyncpa [#allocation3], 1 }

</bundles_post_ra>
